<compile_context>
chip_gen: v7x
topology: tpu7x:2x2x1
jax: 0.10.0
libtpu: 0.0.40
codegen_flags: <defaults>
</compile_context>

<pallas_src>
import functools

import jax
import jax.numpy as jnp
from jax.experimental import pallas as pl
from jax.experimental.pallas import tpu as pltpu

BN_EPS = 1e-5

# Per-pipeline-buffer budget for the streamed x block.  8 MiB is safe on v7x
# (64 MiB physical VMEM, ~32 MiB scoped default); on v5e/v6e (128 MiB VMEM)
# this can be raised to 16-32 MiB for fewer, larger DMAs.
X_BLOCK_BUDGET_BYTES = 8 << 20


def domain_classifier_kernel(x_ref, w1_ref, bgb_ref, w2_ref, b2_ref,
                             out_ref, acc_ref, *, inv_l, lane_width):
    # x_ref:   (bs, T_chunk, C, HW) slice for the current grid step
    # w1_ref:  (C, C)   fc1 weight (unscaled)
    # bgb_ref: (3, C)   rows = [fc1 bias, bn gamma, bn beta]
    # w2_ref:  (C, D)   fc2 weight ; b2_ref: (1, D) fc2 bias
    # acc_ref: (bs, C, lane_width) f32 lane-resident pooled-sum accumulator
    t = pl.program_id(0)

    @pl.when(t == 0)
    def _init():
        acc_ref[...] = jnp.zeros_like(acc_ref)

    # ---- pooling phase: fold HW -> lane_width with aligned lane-slab adds
    # (pure VPU), then sum over the T_chunk axis (leading axis -> VPU adds).
    xs = x_ref[...].astype(jnp.float32)                     # (bs, Tc, C, HW)
    hw = xs.shape[-1]
    folded = xs[..., 0:lane_width]
    for j in range(1, hw // lane_width):                    # static unroll
        folded = folded + xs[..., j * lane_width:(j + 1) * lane_width]
    acc_ref[...] += jnp.sum(folded, axis=1)                 # (bs, C, lane_width)

    @pl.when(t == pl.num_programs(0) - 1)
    def _finalize():
        # Single cross-lane (XLU) reduce + in-kernel pooling-mean scale.
        pooled = jnp.sum(acc_ref[...], axis=-1) * inv_l     # (bs, C)

        bgb = bgb_ref[...]                                  # (3, C)
        b1, gamma, beta = bgb[0:1, :], bgb[1:2, :], bgb[2:3, :]

        # ---- fc1 + ReLU ----
        h = jnp.dot(pooled, w1_ref[...],
                    preferred_element_type=jnp.float32) + b1
        h = jnp.maximum(h, 0.0)

        # ---- BatchNorm1d, training mode: batch stats, biased variance ----
        mu = jnp.mean(h, axis=0, keepdims=True)
        var = jnp.mean((h - mu) ** 2, axis=0, keepdims=True)
        h = (h - mu) * jax.lax.rsqrt(var + BN_EPS)
        h = h * gamma + beta

        # ---- fc2 ----
        logits = jnp.dot(h, w2_ref[...],
                         preferred_element_type=jnp.float32) + b2_ref[...]

        # ---- softmax over last dim ----
        m = jnp.max(logits, axis=-1, keepdims=True)
        e = jnp.exp(logits - m)
        s = jnp.sum(e, axis=-1, keepdims=True)
        r = pl.reciprocal(s, approx=True)    # EUP slot (free)
        r = r * (2.0 - s * r)                # one Newton step -> ~f32 accuracy
        out_ref[...] = (e * r).astype(out_ref.dtype)


def domain_classifier_forward(x, kparams):
    """x: (bs, T, C, H, W). kparams: pre-packed kernel-layout weights."""
    bs, T, C, H, W = x.shape
    HW = H * W

    # Contiguous reshape only -- no transpose, no dtype cast, no HBM copy.
    xr = x.reshape(bs, T, C, HW)

    # ---- T-chunk: largest divisor of T whose block fits the VMEM budget ----
    bytes_per_frame = bs * C * HW * x.dtype.itemsize
    max_tc = max(1, X_BLOCK_BUDGET_BYTES // bytes_per_frame)
    t_chunk = max(d for d in range(1, T + 1) if T % d == 0 and d <= max_tc)
    num_steps = T // t_chunk                     # divisor => no edge-block masking

    # Lane-resident accumulator width (128 when HW is lane-aligned).
    lane_width = 128 if HW % 128 == 0 else HW
    inv_l = 1.0 / float(T * HW)                  # pooling mean, baked at compile time

    w1, bgb, w2, b2 = kparams["w1"], kparams["bgb"], kparams["w2"], kparams["b2"]
    D = w2.shape[1]

    # Double-buffered x block + f32 working temps + tiny weights/acc, with
    # headroom; clamp to a window safe on every generation (<= 48 MiB on v7x).
    x_block_bytes = bs * t_chunk * C * HW * x.dtype.itemsize
    vmem_limit = int(min(max(4 * x_block_bytes + (8 << 20), 32 << 20), 48 << 20))

    kernel = functools.partial(domain_classifier_kernel,
                               inv_l=inv_l, lane_width=lane_width)

    return pl.pallas_call(
        kernel,
        out_shape=jax.ShapeDtypeStruct((bs, D), jnp.float32),
        grid_spec=pltpu.PrefetchScalarGridSpec(
            num_scalar_prefetch=0,
            grid=(num_steps,),                   # reduction over T chunks
            in_specs=[
                pl.BlockSpec((bs, t_chunk, C, HW), lambda t: (0, t, 0, 0)),
                pl.BlockSpec((C, C), lambda t: (0, 0)),
                pl.BlockSpec((3, C), lambda t: (0, 0)),
                pl.BlockSpec((C, D), lambda t: (0, 0)),
                pl.BlockSpec((1, D), lambda t: (0, 0)),
            ],
            out_specs=pl.BlockSpec((bs, D), lambda t: (0, 0)),
            scratch_shapes=[pltpu.VMEM((bs, C, lane_width), jnp.float32)],
        ),
        compiler_params=pltpu.CompilerParams(
            dimension_semantics=("arbitrary",),
            vmem_limit_bytes=vmem_limit,
        ),
    )(xr, w1, bgb, w2, b2)


def init_params(key, in_channels, num_domains=55):
    """Deterministic init mimicking PyTorch Linear defaults (+/- 1/sqrt(fan_in)).
    Weights stored already transposed to (in, out) so kernels do y = x @ W + b."""
    k1, k2, k3, k4 = jax.random.split(key, 4)
    bound = 1.0 / jnp.sqrt(jnp.float32(in_channels))
    w1 = jax.random.uniform(k1, (in_channels, in_channels),
                            minval=-bound, maxval=bound, dtype=jnp.float32)
    b1 = jax.random.uniform(k2, (in_channels,),
                            minval=-bound, maxval=bound, dtype=jnp.float32)
    w2 = jax.random.uniform(k3, (in_channels, num_domains),
                            minval=-bound, maxval=bound, dtype=jnp.float32)
    b2 = jax.random.uniform(k4, (num_domains,),
                            minval=-bound, maxval=bound, dtype=jnp.float32)
    gamma = jnp.ones((in_channels,), jnp.float32)   # BatchNorm1d affine defaults
    beta = jnp.zeros((in_channels,), jnp.float32)
    return {"w1": w1, "b1": b1, "gamma": gamma, "beta": beta,
            "w2": w2, "b2": b2}


def pack_params(params):
    """One-time repack into the kernel layout (done at init, NOT per call)."""
    return {
        "w1": params["w1"].astype(jnp.float32),                        # (C, C)
        "bgb": jnp.stack([params["b1"], params["gamma"], params["beta"]],
                         axis=0).astype(jnp.float32),                  # (3, C)
        "w2": params["w2"].astype(jnp.float32),                        # (C, D)
        "b2": params["b2"].reshape(1, -1).astype(jnp.float32),         # (1, D)
    }


def reference_forward(x, params):
    """Pure-JAX reference matching the PyTorch forward (training-mode BN)."""
    bs, T, C, H, W = x.shape
    pooled = jnp.mean(x.astype(jnp.float32), axis=(3, 4))    # AdaptiveAvgPool2d(1)
    pooled = jnp.mean(pooled, axis=1)                        # mean over T -> (bs, C)
    h = jnp.maximum(pooled @ params["w1"] + params["b1"], 0.0)
    mu = jnp.mean(h, axis=0, keepdims=True)
    var = jnp.mean((h - mu) ** 2, axis=0, keepdims=True)
    h = (h - mu) / jnp.sqrt(var + BN_EPS)
    h = h * params["gamma"] + params["beta"]
    logits = h @ params["w2"] + params["b2"]
    return jax.nn.softmax(logits, axis=-1)


if __name__ == "__main__":
    key = jax.random.PRNGKey(0)
    kx, kp = jax.random.split(key)

    bs, T, C, H, W = 2, 8, 32, 16, 16
    num_domains = 55

    # x may also be fed as bf16 (the kernel upcasts to f32 for accumulation);
    # f32 is used here so the tolerance check against the pure-f32 reference is tight.
    x = jax.random.normal(kx, (bs, T, C, H, W), dtype=jnp.float32)
    params = init_params(kp, C, num_domains)
    kparams = pack_params(params)      # packed once at init time, not per call

    out = domain_classifier_forward(x, kparams)
    out = jax.block_until_ready(out)

    ref = reference_forward(x, params)
    assert out.shape == (bs, num_domains)
    # Slightly relaxed tolerance to accommodate the approx (EUP) reciprocal +
    # one Newton refinement in the softmax denominator.
    assert jnp.allclose(jnp.sum(out, axis=-1), 1.0, atol=1e-3)
    assert jnp.allclose(out, ref, atol=1e-5, rtol=1e-4)

    print("KERNEL_OK")
</pallas_src>

<mosaic_0001>
module attributes {stable_mosaic.version = 11 : i64} {
  func.func @domain_classifier_kernel(%arg0: i32, %arg1: memref<2x8x32x256xf32, #tpu.memory_space<vmem>>, %arg2: memref<32x32xf32, #tpu.memory_space<vmem>>, %arg3: memref<3x32xf32, #tpu.memory_space<vmem>>, %arg4: memref<32x55xf32, #tpu.memory_space<vmem>>, %arg5: memref<1x55xf32, #tpu.memory_space<vmem>>, %arg6: memref<2x55xf32, #tpu.memory_space<vmem>>, %arg7: memref<2x32x128xf32, #tpu.memory_space<vmem>>) attributes {dimension_semantics = [#tpu.dimension_semantics<arbitrary>], iteration_bounds = array<i64: 1>, scalar_prefetch = 0 : i64, scratch_operands = 1 : i64, tpu.core_type = #tpu.core_type<tc>, window_params = [{transform_indices = @transform_0, window_bounds = array<i64: 2, 8, 32, 256>}, {pipeline_mode = #tpu.pipeline_mode<synchronous>, transform_indices = @transform_1, window_bounds = array<i64: 32, 32>}, {pipeline_mode = #tpu.pipeline_mode<synchronous>, transform_indices = @transform_2, window_bounds = array<i64: 3, 32>}, {pipeline_mode = #tpu.pipeline_mode<synchronous>, transform_indices = @transform_3, window_bounds = array<i64: 32, 55>}, {pipeline_mode = #tpu.pipeline_mode<synchronous>, transform_indices = @transform_4, window_bounds = array<i64: 1, 55>}, {pipeline_mode = #tpu.pipeline_mode<synchronous>, transform_indices = @transform_5, window_bounds = array<i64: 2, 55>}]} {
    %c0_i32 = arith.constant 0 : i32
    %0 = arith.cmpi eq, %arg0, %c0_i32 : i32
    %1 = arith.extui %0 : i1 to i32
    %c0_i32_0 = arith.constant 0 : i32
    %2 = arith.cmpi ne, %1, %c0_i32_0 : i32
    scf.if %2 {
      %cst_12 = arith.constant 0.000000e+00 : f32
      %14 = vector.broadcast %cst_12 : f32 to vector<2x32x128xf32>
      %c0_13 = arith.constant 0 : index
      %c0_14 = arith.constant 0 : index
      %c0_15 = arith.constant 0 : index
      %15 = vector.load %arg7[%c0_13, %c0_14, %c0_15] : memref<2x32x128xf32, #tpu.memory_space<vmem>>, vector<2x32x128xf32>
      tpu.vector_store %arg7[%c0_13, %c0_14, %c0_15], %14 {strides = array<i32>} : memref<2x32x128xf32, #tpu.memory_space<vmem>>, vector<2x32x128xf32>,
    } else {
    }
    %c0 = arith.constant 0 : index
    %c0_1 = arith.constant 0 : index
    %c0_2 = arith.constant 0 : index
    %c0_3 = arith.constant 0 : index
    %3 = vector.load %arg1[%c0, %c0_1, %c0_2, %c0_3] : memref<2x8x32x256xf32, #tpu.memory_space<vmem>>, vector<2x8x32x256xf32>
    %4 = vector.extract_strided_slice %3 {offsets = [0, 0, 0, 0], sizes = [2, 8, 32, 128], strides = [1, 1, 1, 1]} : vector<2x8x32x256xf32> to vector<2x8x32x128xf32>
    %5 = vector.extract_strided_slice %3 {offsets = [0, 0, 0, 128], sizes = [2, 8, 32, 128], strides = [1, 1, 1, 1]} : vector<2x8x32x256xf32> to vector<2x8x32x128xf32>
    %6 = arith.addf %4, %5 : vector<2x8x32x128xf32>
    %c0_4 = arith.constant 0 : index
    %c0_5 = arith.constant 0 : index
    %c0_6 = arith.constant 0 : index
    %7 = vector.load %arg7[%c0_4, %c0_5, %c0_6] : memref<2x32x128xf32, #tpu.memory_space<vmem>>, vector<2x32x128xf32>
    %cst = arith.constant dense<0.000000e+00> : vector<2x32x128xf32>
    %8 = vector.multi_reduction <add>, %6, %cst [1] : vector<2x8x32x128xf32> to vector<2x32x128xf32>
    %9 = arith.addf %7, %8 : vector<2x32x128xf32>
    %c0_7 = arith.constant 0 : index
    %c0_8 = arith.constant 0 : index
    %c0_9 = arith.constant 0 : index
    %10 = vector.load %arg7[%c0_7, %c0_8, %c0_9] : memref<2x32x128xf32, #tpu.memory_space<vmem>>, vector<2x32x128xf32>
    tpu.vector_store %arg7[%c0_7, %c0_8, %c0_9], %9 {strides = array<i32>} : memref<2x32x128xf32, #tpu.memory_space<vmem>>, vector<2x32x128xf32>,
    %c0_i32_10 = arith.constant 0 : i32
    %11 = arith.cmpi eq, %arg0, %c0_i32_10 : i32
    %12 = arith.extui %11 : i1 to i32
    %c0_i32_11 = arith.constant 0 : i32
    %13 = arith.cmpi ne, %12, %c0_i32_11 : i32
    scf.if %13 {
      %c0_12 = arith.constant 0 : index
      %c0_13 = arith.constant 0 : index
      %c0_14 = arith.constant 0 : index
      %14 = vector.load %arg7[%c0_12, %c0_13, %c0_14] : memref<2x32x128xf32, #tpu.memory_space<vmem>>, vector<2x32x128xf32>
      %cst_15 = arith.constant dense<0.000000e+00> : vector<2x32xf32>
      %15 = vector.multi_reduction <add>, %14, %cst_15 [2] : vector<2x32x128xf32> to vector<2x32xf32>
      %cst_16 = arith.constant 4.8828125E-4 : f32
      %16 = vector.broadcast %cst_16 : f32 to vector<2x32xf32>
      %17 = arith.mulf %15, %16 : vector<2x32xf32>
      %c0_17 = arith.constant 0 : index
      %c0_18 = arith.constant 0 : index
      %18 = vector.load %arg3[%c0_17, %c0_18] : memref<3x32xf32, #tpu.memory_space<vmem>>, vector<3x32xf32>
      %19 = vector.extract_strided_slice %18 {offsets = [0, 0], sizes = [1, 32], strides = [1, 1]} : vector<3x32xf32> to vector<1x32xf32>
      %20 = vector.extract_strided_slice %18 {offsets = [1, 0], sizes = [1, 32], strides = [1, 1]} : vector<3x32xf32> to vector<1x32xf32>
      %21 = vector.extract_strided_slice %18 {offsets = [2, 0], sizes = [1, 32], strides = [1, 1]} : vector<3x32xf32> to vector<1x32xf32>
      %c0_19 = arith.constant 0 : index
      %c0_20 = arith.constant 0 : index
      %22 = vector.load %arg2[%c0_19, %c0_20] : memref<32x32xf32, #tpu.memory_space<vmem>>, vector<32x32xf32>
      %cst_21 = arith.constant dense<0.000000e+00> : vector<2x32xf32>
      %23 = tpu.matmul %17, %22, %cst_21 {dimension_numbers = #tpu.dot_dimension_numbers<[1], [0], [0], [1], [0, 0, 1, 1], [], []>} : vector<2x32xf32>, vector<32x32xf32>, vector<2x32xf32> -> vector<2x32xf32>
      %24 = vector.broadcast %19 : vector<1x32xf32> to vector<2x32xf32>
      %25 = arith.addf %23, %24 : vector<2x32xf32>
      %cst_22 = arith.constant 0.000000e+00 : f32
      %26 = vector.broadcast %cst_22 : f32 to vector<2x32xf32>
      %27 = arith.maximumf %25, %26 : vector<2x32xf32>
      %cst_23 = arith.constant dense<0.000000e+00> : vector<32xf32>
      %28 = vector.multi_reduction <add>, %27, %cst_23 [0] : vector<2x32xf32> to vector<32xf32>
      %29 = vector.shape_cast %28 : vector<32xf32> to vector<1x32xf32>
      %cst_24 = arith.constant 2.000000e+00 : f32
      %30 = vector.broadcast %cst_24 : f32 to vector<1x32xf32>
      %31 = arith.divf %29, %30 : vector<1x32xf32>
      %32 = vector.broadcast %31 : vector<1x32xf32> to vector<2x32xf32>
      %33 = arith.subf %27, %32 : vector<2x32xf32>
      %34 = arith.mulf %33, %33 : vector<2x32xf32>
      %cst_25 = arith.constant dense<0.000000e+00> : vector<32xf32>
      %35 = vector.multi_reduction <add>, %34, %cst_25 [0] : vector<2x32xf32> to vector<32xf32>
      %36 = vector.shape_cast %35 : vector<32xf32> to vector<1x32xf32>
      %cst_26 = arith.constant 2.000000e+00 : f32
      %37 = vector.broadcast %cst_26 : f32 to vector<1x32xf32>
      %38 = arith.divf %36, %37 : vector<1x32xf32>
      %39 = vector.broadcast %31 : vector<1x32xf32> to vector<2x32xf32>
      %40 = arith.subf %27, %39 : vector<2x32xf32>
      %cst_27 = arith.constant 9.99999974E-6 : f32
      %41 = vector.broadcast %cst_27 : f32 to vector<1x32xf32>
      %42 = arith.addf %38, %41 : vector<1x32xf32>
      %43 = math.rsqrt %42 : vector<1x32xf32>
      %44 = vector.broadcast %43 : vector<1x32xf32> to vector<2x32xf32>
      %45 = arith.mulf %40, %44 : vector<2x32xf32>
      %46 = vector.broadcast %20 : vector<1x32xf32> to vector<2x32xf32>
      %47 = arith.mulf %45, %46 : vector<2x32xf32>
      %48 = vector.broadcast %21 : vector<1x32xf32> to vector<2x32xf32>
      %49 = arith.addf %47, %48 : vector<2x32xf32>
      %c0_28 = arith.constant 0 : index
      %c0_29 = arith.constant 0 : index
      %50 = vector.load %arg4[%c0_28, %c0_29] : memref<32x55xf32, #tpu.memory_space<vmem>>, vector<32x55xf32>
      %cst_30 = arith.constant dense<0.000000e+00> : vector<2x55xf32>
      %51 = tpu.matmul %49, %50, %cst_30 {dimension_numbers = #tpu.dot_dimension_numbers<[1], [0], [0], [1], [0, 0, 1, 1], [], []>} : vector<2x32xf32>, vector<32x55xf32>, vector<2x55xf32> -> vector<2x55xf32>
      %c0_31 = arith.constant 0 : index
      %c0_32 = arith.constant 0 : index
      %52 = vector.load %arg5[%c0_31, %c0_32] : memref<1x55xf32, #tpu.memory_space<vmem>>, vector<1x55xf32>
      %53 = vector.broadcast %52 : vector<1x55xf32> to vector<2x55xf32>
      %54 = arith.addf %51, %53 : vector<2x55xf32>
      %cst_33 = arith.constant dense<0xFF800000> : vector<2xf32>
      %55 = vector.multi_reduction <maximumf>, %54, %cst_33 [1] : vector<2x55xf32> to vector<2xf32>
      %56 = vector.shape_cast %55 : vector<2xf32> to vector<2x1xf32>
      %57 = vector.broadcast %56 : vector<2x1xf32> to vector<2x55xf32>
      %58 = arith.subf %54, %57 : vector<2x55xf32>
      %59 = math.exp %58 : vector<2x55xf32>
      %cst_34 = arith.constant dense<0.000000e+00> : vector<2xf32>
      %60 = vector.multi_reduction <add>, %59, %cst_34 [1] : vector<2x55xf32> to vector<2xf32>
      %61 = vector.shape_cast %60 : vector<2xf32> to vector<2x1xf32>
      %62 = tpu.reciprocal %61 {approx = true} : vector<2x1xf32> -> vector<2x1xf32>
      %63 = arith.mulf %61, %62 : vector<2x1xf32>
      %cst_35 = arith.constant 2.000000e+00 : f32
      %64 = vector.broadcast %cst_35 : f32 to vector<2x1xf32>
      %65 = arith.subf %64, %63 : vector<2x1xf32>
      %66 = arith.mulf %62, %65 : vector<2x1xf32>
      %67 = vector.broadcast %66 : vector<2x1xf32> to vector<2x55xf32>
      %68 = arith.mulf %59, %67 : vector<2x55xf32>
      %c0_36 = arith.constant 0 : index
      %c0_37 = arith.constant 0 : index
      %69 = vector.load %arg6[%c0_36, %c0_37] : memref<2x55xf32, #tpu.memory_space<vmem>>, vector<2x55xf32>
      tpu.vector_store %arg6[%c0_36, %c0_37], %68 {strides = array<i32>} : memref<2x55xf32, #tpu.memory_space<vmem>>, vector<2x55xf32>,
    } else {
    }
    return
  }
  func.func @transform_0(%arg0: i32) -> (i32, i32, i32, i32) {
    %c0_i32 = arith.constant 0 : i32
    %c0_i32_0 = arith.constant 0 : i32
    %c0_i32_1 = arith.constant 0 : i32
    %c0_i32_2 = arith.constant 0 : i32
    return %c0_i32, %arg0, %c0_i32_0, %c0_i32_1 : i32, i32, i32, i32
  }
  func.func @transform_1(%arg0: i32) -> (i32, i32) {
    %c0_i32 = arith.constant 0 : i32
    %c0_i32_0 = arith.constant 0 : i32
    %c0_i32_1 = arith.constant 0 : i32
    return %c0_i32, %c0_i32_0 : i32, i32
  }
  func.func @transform_2(%arg0: i32) -> (i32, i32) {
    %c0_i32 = arith.constant 0 : i32
    %c0_i32_0 = arith.constant 0 : i32
    %c0_i32_1 = arith.constant 0 : i32
    return %c0_i32, %c0_i32_0 : i32, i32
  }
  func.func @transform_3(%arg0: i32) -> (i32, i32) {
    %c0_i32 = arith.constant 0 : i32
    %c0_i32_0 = arith.constant 0 : i32
    %c0_i32_1 = arith.constant 0 : i32
    return %c0_i32, %c0_i32_0 : i32, i32
  }
  func.func @transform_4(%arg0: i32) -> (i32, i32) {
    %c0_i32 = arith.constant 0 : i32
    %c0_i32_0 = arith.constant 0 : i32
    %c0_i32_1 = arith.constant 0 : i32
    return %c0_i32, %c0_i32_0 : i32, i32
  }
  func.func @transform_5(%arg0: i32) -> (i32, i32) {
    %c0_i32 = arith.constant 0 : i32
    %c0_i32_0 = arith.constant 0 : i32
    %c0_i32_1 = arith.constant 0 : i32
    return %c0_i32, %c0_i32_0 : i32, i32
  }
}

</mosaic_0001>

<bundles_post_ra>
// kernel: tpu_custom_call.1
= control target key start
LH: loop header
LB: loop body
LE: loop exit
PB: predicated region body
PF: predicated region fallthrough
CT: control target
= control target key end

     0   :  { %10 = vsyncpa [#allocation4], 0  ;;  %s946_s0 = inlined_call_operand.hbm [shape: f32[2,8,32,256], index: 0, kind: input, shape index: {}]   ;;  %s947_s1 = inlined_call_operand.hbm [shape: f32[32,32], index: 1, kind: input, shape index: {}]   ;;  %s948_s2 = inlined_call_operand.vmem [shape: f32[3,32], index: 2, kind: input, shape index: {}]   ;;  %s949_s3 = inlined_call_operand.hbm [shape: f32[32,55], index: 3, kind: input, shape index: {}]   ;;  %s950_s4 = inlined_call_operand.vmem [shape: f32[1,55], index: 4, kind: input, shape index: {}]   ;;  %s951_s5 = inlined_call_operand.hbm [shape: f32[2,55], index: 5, kind: output, shape index: {}]  }
   0x1   :  { %11 = vsyncpa [#allocation7], 0 }
   0x2   :  { %12 = vsyncpa [#allocation5], 0  ;;  %s827_s18 = smov [#allocation6]   ;;  %s733_s22 = scalar_lea.hbm %s947_s1, 512 }
   0x3   :  { %s30_s19 = sshll.u32 %s827_s18, 4  ;;  %p734_p0 = scmp.ne.s32.totalorder %s947_s1, %s733_s22  ;;  %s31_s19 = int_to_ptr.vmem [resolvable:$true] %s30_s19 }
   0x4   :  { %p737_p1 = scmp.lt.u32.totalorder %s733_s22, %s947_s1 }
   0x6   :  { %p739_p2 = pnand %p737_p1, %p734_p0 }
   0x8   :  { %742 = shalt.err (!%p739_p2)
}
   0x9   :  { %s743_s27 = scalar_lea.vmem %s31_s19, 512  ;;  %p748_p4 = scmp.lt.s32.totalorder %s31_s19, %s31_s19 }
   0xa   :  { %p744_p3 = scmp.ne.s32.totalorder %s31_s19, %s743_s27  ;;  %p749_p5 = scmp.lt.s32.totalorder %s743_s27, %s743_s27 }
   0xc   :  { %p750_p6 = por %p749_p5, %p748_p4 }
   0xe   :  { %p751_p7 = pnand %p750_p6, %p744_p3 }
  0x10   :  { %754 = shalt.err (!%p751_p7)
}
  0x11   :  { %s828_s28 = smov 128   ;;  %s829_s29 = smov 8  }
  0x12   :  { %36 = dma.hbm_to_vmem [thread:$0]  %s947_s1, 512, %s31_s19, [#allocation7], %s828_s28, %s828_s28, %s829_s29  }
  0x13   :  { %s830_s7 = smov [#allocation3]   ;;  %s755_s11 = scalar_lea.hbm %s946_s0, 16384 }
  0x14   :  { %s18_s8 = sshll.u32 %s830_s7, 4  ;;  %p756_p8 = scmp.ne.s32.totalorder %s946_s0, %s755_s11  ;;  %s19_s8 = int_to_ptr.vmem [resolvable:$true] %s18_s8 }
  0x15   :  { %p759_p9 = scmp.lt.u32.totalorder %s755_s11, %s946_s0 }
  0x17   :  { %p761_p10 = pnand %p759_p9, %p756_p8 }
  0x19   :  { %764 = shalt.err (!%p761_p10)
}
  0x1a   :  { %s765_s16 = scalar_lea.vmem %s19_s8, 16384  ;;  %p770_p12 = scmp.lt.s32.totalorder %s19_s8, %s19_s8 }
  0x1b   :  { %p766_p11 = scmp.ne.s32.totalorder %s19_s8, %s765_s16  ;;  %p771_p13 = scmp.lt.s32.totalorder %s765_s16, %s765_s16 }
  0x1d   :  { %p772_p0 = por %p771_p13, %p770_p12 }
  0x1f   :  { %p773_p1 = pnand %p772_p0, %p766_p11 }
  0x21   :  { %776 = shalt.err (!%p773_p1)
}
  0x22   :  { %s831_s1 = smov 256   ;;  %s832_s17 = smov 16  }
  0x23   :  { %24 = dma.hbm_to_vmem [thread:$0]  %s946_s0, 16384, %s19_s8, [#allocation4], %s831_s1, %s831_s1, %s832_s17  }
  0x24   :  { %s833_s20 = smov [#allocation8]   ;;  %s777_s24 = scalar_lea.hbm %s949_s3, 512 }
  0x25   :  { %s44_s21 = sshll.u32 %s833_s20, 4  ;;  %p778_p2 = scmp.ne.s32.totalorder %s949_s3, %s777_s24  ;;  %s45_s21 = int_to_ptr.vmem [resolvable:$true] %s44_s21 }
  0x26   :  { %p781_p3 = scmp.lt.u32.totalorder %s777_s24, %s949_s3 }
  0x28   :  { %p783_p4 = pnand %p781_p3, %p778_p2 }
  0x2a   :  { %786 = shalt.err (!%p783_p4)
}
  0x2b   :  { %s787_s6 = scalar_lea.vmem %s45_s21, 512  ;;  %p792_p6 = scmp.lt.s32.totalorder %s45_s21, %s45_s21 }
  0x2c   :  { %p788_p5 = scmp.ne.s32.totalorder %s45_s21, %s787_s6  ;;  %p793_p7 = scmp.lt.s32.totalorder %s787_s6, %s787_s6 }
  0x2e   :  { %p794_p8 = por %p793_p7, %p792_p6 }
  0x30   :  { %p795_p9 = pnand %p794_p8, %p788_p5 }
  0x32   :  { %798 = shalt.err (!%p795_p9)
}
  0x33   :  { %50 = dma.hbm_to_vmem [thread:$0]  %s949_s3, 512, %s45_s21, [#allocation7], %s828_s28, %s828_s28, %s829_s29  }
  0x34   :  { %821 = dma.done.wait [#allocation4], 16384  }
  0x35   :  { %822 = vsyncadd [#allocation4], 4294950912 }
  0x36   :  { %823 = dma.done.wait [#allocation7], 1024  }
  0x37   :  { %824 = vsyncadd [#allocation7], 4294966272  ;;  %v138_v0 = vld [vmem:[#allocation3 + $0x200] sm:$0xff]  ;;  %v139_v1 = vld [vmem:[#allocation3 + $0x208] sm:$0xff]  ;;  %vm835_vm0 = vmmov 0   ;;  %vm409_vm1 = vcmask 130112  }
  0x38   :  { %v146_v2 = vld [vmem:[#allocation3 + $0x240] sm:$0xff]  ;;  %v147_v3 = vld [vmem:[#allocation3 + $0x248] sm:$0xff]  ;;  %v234_v6 = vadd.f32 %v139_v1, %v138_v0  ;;  %v140_v46 = vld [vmem:[#allocation3 + $0x210] sm:$0xff]  ;;  %vm416_vm2 = vcmask 195712   ;;  %vm423_vm3 = vcmask 261312   ;;  %vm444_vm4 = vcmask 1041409  }
  0x39   :  { %v154_v4 = vld [vmem:[#allocation3 + $0x280] sm:$0xff]  ;;  %v155_v5 = vld [vmem:[#allocation3 + $0x288] sm:$0xff]  ;;  %v238_v9 = vadd.f32 %v147_v3, %v146_v2  ;;  %v141_v49 = vld [vmem:[#allocation3 + $0x218] sm:$0xff]  ;;  %vm446_vm5 = vcmask 261120   ;;  %vm520_vm6 = vcmask 254976   ;;  %vm637_vm7 = vcmask 443392  }
  0x3a   :  { %v162_v7 = vld [vmem:[#allocation3 + $0x2c0] sm:$0xff]  ;;  %v163_v8 = vld [vmem:[#allocation3 + $0x2c8] sm:$0xff]  ;;  %v242_v10 = vadd.f32 %v155_v5, %v154_v4  ;;  %v148_v50 = vld [vmem:[#allocation3 + $0x250] sm:$0xff]  ;;  %v235_v57 = vadd.f32 %v141_v49, %v140_v46 }
  0x3b   :  { %v170_v11 = vld [vmem:[#allocation3 + $0x300] sm:$0xff]  ;;  %v171_v12 = vld [vmem:[#allocation3 + $0x308] sm:$0xff]  ;;  %v246_v15 = vadd.f32 %v163_v8, %v162_v7  ;;  %v302_v16 = vadd.f32 %v238_v9, %v234_v6  ;;  %v149_v51 = vld [vmem:[#allocation3 + $0x258] sm:$0xff] }
  0x3c   :  { %v178_v13 = vld [vmem:[#allocation3 + $0x340] sm:$0xff]  ;;  %v179_v14 = vld [vmem:[#allocation3 + $0x348] sm:$0xff]  ;;  %v250_v21 = vadd.f32 %v171_v12, %v170_v11  ;;  %v156_v54 = vld [vmem:[#allocation3 + $0x290] sm:$0xff]  ;;  %v239_v58 = vadd.f32 %v149_v51, %v148_v50 }
  0x3d   :  { %v186_v17 = vld [vmem:[#allocation3 + $0x380] sm:$0xff]  ;;  %v187_v18 = vld [vmem:[#allocation3 + $0x388] sm:$0xff]  ;;  %v303_v22 = vadd.f32 %v302_v16, %v242_v10  ;;  %v254_v32 = vadd.f32 %v179_v14, %v178_v13  ;;  %v157_v55 = vld [vmem:[#allocation3 + $0x298] sm:$0xff] }
  0x3e   :  { %v74_v19 = vld [vmem:[#allocation3] sm:$0xff]  ;;  %v75_v20 = vld [vmem:[#allocation3 + $0x8] sm:$0xff]  ;;  %v258_v42 = vadd.f32 %v187_v18, %v186_v17  ;;  %v164_v56 = vld [vmem:[#allocation3 + $0x2d0] sm:$0xff]  ;;  %v243_v0 = vadd.f32 %v157_v55, %v156_v54  ;;  %v309_v6 = vadd.f32 %v239_v58, %v235_v57 }
  0x3f   :  { %v82_v23 = vld [vmem:[#allocation3 + $0x40] sm:$0xff]  ;;  %v83_v24 = vld [vmem:[#allocation3 + $0x48] sm:$0xff]  ;;  %v202_v26 = vadd.f32 %v75_v20, %v74_v19  ;;  %v304_v33 = vadd.f32 %v303_v22, %v246_v15  ;;  %v165_v61 = vld [vmem:[#allocation3 + $0x2d8] sm:$0xff] }
  0x40   :  { %v90_v25 = vld [vmem:[#allocation3 + $0x80] sm:$0xff]  ;;  %v91_v27 = vld [vmem:[#allocation3 + $0x88] sm:$0xff]  ;;  %v206_v30 = vadd.f32 %v83_v24, %v82_v23  ;;  %v172_v62 = vld [vmem:[#allocation3 + $0x310] sm:$0xff]  ;;  %v247_v5 = vadd.f32 %v165_v61, %v164_v56  ;;  %v310_v15 = vadd.f32 %v309_v6, %v243_v0 }
  0x41   :  { %v98_v28 = vld [vmem:[#allocation3 + $0xc0] sm:$0xff]  ;;  %v99_v29 = vld [vmem:[#allocation3 + $0xc8] sm:$0xff]  ;;  %v210_v36 = vadd.f32 %v91_v27, %v90_v25  ;;  %v305_v43 = vadd.f32 %v304_v33, %v250_v21  ;;  %v173_v63 = vld [vmem:[#allocation3 + $0x318] sm:$0xff] }
  0x42   :  { %v194_v31 = vld [vmem:[#allocation3 + $0x3c0] sm:$0xff]  ;;  %v107_v35 = vld [vmem:[#allocation3 + $0x108] sm:$0xff]  ;;  %v214_v40 = vadd.f32 %v99_v29, %v98_v28  ;;  %v274_v41 = vadd.f32 %v206_v30, %v202_v26  ;;  %v180_v4 = vld [vmem:[#allocation3 + $0x350] sm:$0xff]  ;;  %v251_v14 = vadd.f32 %v173_v63, %v172_v62  ;;  %v311_v27 = vadd.f32 %v310_v15, %v247_v5 }
  0x43   :  { %v106_v34 = vld [vmem:[#allocation3 + $0x100] sm:$0xff]  ;;  %v195_v37 = vld [vmem:[#allocation3 + $0x3c8] sm:$0xff]  ;;  %v306_v53 = vadd.f32 %v305_v43, %v254_v32  ;;  %v181_v9 = vld [vmem:[#allocation3 + $0x358] sm:$0xff] }
  0x44   :  { %v114_v38 = vld [vmem:[#allocation3 + $0x140] sm:$0xff]  ;;  %v115_v39 = vld [vmem:[#allocation3 + $0x148] sm:$0xff]  ;;  %v218_v47 = vadd.f32 %v107_v35, %v106_v34  ;;  %v275_v48 = vadd.f32 %v274_v41, %v210_v36  ;;  %v262_v52 = vadd.f32 %v195_v37, %v194_v31  ;;  %v188_v10 = vld [vmem:[#allocation3 + $0x390] sm:$0xff]  ;;  %v255_v26 = vadd.f32 %v181_v9, %v180_v4 }
  0x45   :  { %v122_v44 = vld [vmem:[#allocation3 + $0x180] sm:$0xff]  ;;  %v123_v45 = vld [vmem:[#allocation3 + $0x188] sm:$0xff]  ;;  %v222_v59 = vadd.f32 %v115_v39, %v114_v38  ;;  %v307_v1 = vadd.f32 %v306_v53, %v258_v42  ;;  %v189_v11 = vld [vmem:[#allocation3 + $0x398] sm:$0xff]  ;;  %v312_v36 = vadd.f32 %v311_v27, %v251_v14 }
  0x46   :  { %v276_v60 = vadd.f32 %v275_v48, %v214_v40  ;;  %v130_v2 = vld [vmem:[#allocation3 + $0x1c0] sm:$0xff]  ;;  %v131_v3 = vld [vmem:[#allocation3 + $0x1c8] sm:$0xff]  ;;  %v226_v7 = vadd.f32 %v123_v45, %v122_v44  ;;  %v196_v13 = vld [vmem:[#allocation3 + $0x3d0] sm:$0xff]  ;;  %v259_v35 = vadd.f32 %v189_v11, %v188_v10 }
  0x47   :  { %v308_v12 = vadd.f32 %v307_v1, %v262_v52  ;;  %v76_v16 = vld [vmem:[#allocation3 + $0x10] sm:$0xff]  ;;  %v77_v17 = vld [vmem:[#allocation3 + $0x18] sm:$0xff]  ;;  %v230_v19 = vadd.f32 %v131_v3, %v130_v2  ;;  %v142_v45 = vld [vmem:[#allocation3 + $0x220] sm:$0xff] }
  0x48   :  { %v277_v8 = vadd.f32 %v276_v60, %v218_v47  ;;  %v84_v18 = vld [vmem:[#allocation3 + $0x50] sm:$0xff]  ;;  %v85_v21 = vld [vmem:[#allocation3 + $0x58] sm:$0xff]  ;;  %v203_v24 = vadd.f32 %v77_v17, %v76_v16  ;;  %v143_v46 = vld [vmem:[#allocation3 + $0x228] sm:$0xff]  ;;  %v313_v47 = vadd.f32 %v312_v36, %v255_v26 }
  0x49   :  { %v92_v22 = vld [vmem:[#allocation3 + $0x90] sm:$0xff]  ;;  %v93_v23 = vld [vmem:[#allocation3 + $0x98] sm:$0xff]  ;;  %365 = vadd.xlane.f32.xlu1 %v308_v12  ;;  %v207_v30 = vadd.f32 %v85_v21, %v84_v18  ;;  %v150_v50 = vld [vmem:[#allocation3 + $0x260] sm:$0xff]  ;;  %v236_v53 = vadd.f32 %v143_v46, %v142_v45 }
  0x4a   :  { %v278_v20 = vadd.f32 %v277_v8, %v222_v59  ;;  %v197_v25 = vld [vmem:[#allocation3 + $0x3d8] sm:$0xff]  ;;  %v100_v28 = vld [vmem:[#allocation3 + $0xd0] sm:$0xff]  ;;  %v211_v31 = vadd.f32 %v93_v23, %v92_v22  ;;  %v151_v51 = vld [vmem:[#allocation3 + $0x268] sm:$0xff]  ;;  %v314_v58 = vadd.f32 %v313_v47, %v259_v35 }
  0x4b   :  { %v101_v29 = vld [vmem:[#allocation3 + $0xd8] sm:$0xff]  ;;  %v108_v33 = vld [vmem:[#allocation3 + $0x110] sm:$0xff]  ;;  %v281_v40 = vadd.f32 %v207_v30, %v203_v24  ;;  %v263_v42 = vadd.f32 %v197_v25, %v196_v13  ;;  %v158_v52 = vld [vmem:[#allocation3 + $0x2a0] sm:$0xff]  ;;  %v240_v57 = vadd.f32 %v151_v51, %v150_v50 }
  0x4c   :  { %v279_v32 = vadd.f32 %v278_v20, %v226_v7  ;;  %v109_v34 = vld [vmem:[#allocation3 + $0x118] sm:$0xff]  ;;  %v116_v37 = vld [vmem:[#allocation3 + $0x150] sm:$0xff]  ;;  %v215_v39 = vadd.f32 %v101_v29, %v100_v28  ;;  %v159_v54 = vld [vmem:[#allocation3 + $0x2a8] sm:$0xff] }
  0x4d   :  { %v117_v38 = vld [vmem:[#allocation3 + $0x158] sm:$0xff]  ;;  %v124_v43 = vld [vmem:[#allocation3 + $0x190] sm:$0xff]  ;;  %v219_v48 = vadd.f32 %v109_v34, %v108_v33  ;;  %v282_v49 = vadd.f32 %v281_v40, %v211_v31  ;;  %v166_v55 = vld [vmem:[#allocation3 + $0x2e0] sm:$0xff]  ;;  %v244_v0 = vadd.f32 %v159_v54, %v158_v52  ;;  %v316_v5 = vadd.f32 %v240_v57, %v236_v53 }
  0x4e   :  { %v280_v41 = vadd.f32 %v279_v32, %v230_v19  ;;  %v125_v44 = vld [vmem:[#allocation3 + $0x198] sm:$0xff]  ;;  %v167_v56 = vld [vmem:[#allocation3 + $0x2e8] sm:$0xff]  ;;  %v132_v59 = vld [vmem:[#allocation3 + $0x1d0] sm:$0xff]  ;;  %v223_v60 = vadd.f32 %v117_v38, %v116_v37  ;;  %v315_v6 = vadd.f32 %v314_v58, %v263_v42 }
  0x4f   :  { %v283_v61 = vadd.f32 %v282_v49, %v215_v39  ;;  %v174_v62 = vld [vmem:[#allocation3 + $0x320] sm:$0xff]  ;;  %v175_v63 = vld [vmem:[#allocation3 + $0x328] sm:$0xff]  ;;  %v133_v1 = vld [vmem:[#allocation3 + $0x1d8] sm:$0xff]  ;;  %v248_v4 = vadd.f32 %v167_v56, %v166_v55  ;;  %v227_v7 = vadd.f32 %v125_v44, %v124_v43  ;;  %v317_v13 = vadd.f32 %v316_v5, %v244_v0 }
  0x50   :  { %357 = vadd.xlane.f32.xlu0 %v280_v41  ;;  %v182_v2 = vld [vmem:[#allocation3 + $0x360] sm:$0xff]  ;;  %v183_v3 = vld [vmem:[#allocation3 + $0x368] sm:$0xff]  ;;  %v252_v12 = vadd.f32 %v175_v63, %v174_v62  ;;  %367 = vadd.xlane.f32.xlu1 %v315_v6  ;;  %v231_v17 = vadd.f32 %v133_v1, %v132_v59  ;;  %v144_v45 = vld [vmem:[#allocation3 + $0x230] sm:$0xff] }
  0x51   :  { %v284_v8 = vadd.f32 %v283_v61, %v219_v48  ;;  %v190_v9 = vld [vmem:[#allocation3 + $0x3a0] sm:$0xff]  ;;  %v191_v10 = vld [vmem:[#allocation3 + $0x3a8] sm:$0xff]  ;;  %v256_v24 = vadd.f32 %v183_v3, %v182_v2  ;;  %v318_v25 = vadd.f32 %v317_v13, %v248_v4  ;;  %v145_v46 = vld [vmem:[#allocation3 + $0x238] sm:$0xff] }
  0x52   :  { %v78_v11 = vld [vmem:[#allocation3 + $0x20] sm:$0xff]  ;;  %v79_v14 = vld [vmem:[#allocation3 + $0x28] sm:$0xff]  ;;  %v260_v36 = vadd.f32 %v191_v10, %v190_v9  ;;  %v152_v47 = vld [vmem:[#allocation3 + $0x270] sm:$0xff]  ;;  %v237_v53 = vadd.f32 %v145_v46, %v144_v45 }
  0x53   :  { %v86_v15 = vld [vmem:[#allocation3 + $0x60] sm:$0xff]  ;;  %v87_v16 = vld [vmem:[#allocation3 + $0x68] sm:$0xff]  ;;  %v285_v18 = vadd.f32 %v284_v8, %v223_v60  ;;  %v204_v22 = vadd.f32 %v79_v14, %v78_v11  ;;  %v319_v37 = vadd.f32 %v318_v25, %v252_v12  ;;  %v153_v50 = vld [vmem:[#allocation3 + $0x278] sm:$0xff] }
  0x54   :  { %v94_v19 = vld [vmem:[#allocation3 + $0xa0] sm:$0xff]  ;;  %v95_v20 = vld [vmem:[#allocation3 + $0xa8] sm:$0xff]  ;;  %v208_v23 = vadd.f32 %v87_v16, %v86_v15  ;;  %v160_v51 = vld [vmem:[#allocation3 + $0x2b0] sm:$0xff]  ;;  %v241_v59 = vadd.f32 %v153_v50, %v152_v47 }
  0x55   :  { %v102_v21 = vld [vmem:[#allocation3 + $0xe0] sm:$0xff]  ;;  %v103_v26 = vld [vmem:[#allocation3 + $0xe8] sm:$0xff]  ;;  %v212_v29 = vadd.f32 %v95_v20, %v94_v19  ;;  %v286_v30 = vadd.f32 %v285_v18, %v227_v7  ;;  %v320_v49 = vadd.f32 %v319_v37, %v256_v24  ;;  %v161_v52 = vld [vmem:[#allocation3 + $0x2b8] sm:$0xff] }
  0x56   :  { %v110_v27 = vld [vmem:[#allocation3 + $0x120] sm:$0xff]  ;;  %v111_v28 = vld [vmem:[#allocation3 + $0x128] sm:$0xff]  ;;  %v216_v34 = vadd.f32 %v103_v26, %v102_v21  ;;  %v288_v35 = vadd.f32 %v208_v23, %v204_v22  ;;  %v168_v57 = vld [vmem:[#allocation3 + $0x2f0] sm:$0xff]  ;;  %v245_v60 = vadd.f32 %v161_v52, %v160_v51  ;;  %v323_v5 = vadd.f32 %v241_v59, %v237_v53 }
  0x57   :  { %v198_v31 = vld [vmem:[#allocation3 + $0x3e0] sm:$0xff]  ;;  %v199_v32 = vld [vmem:[#allocation3 + $0x3e8] sm:$0xff]  ;;  %v287_v41 = vadd.f32 %v286_v30, %v231_v17  ;;  %v220_v43 = vadd.f32 %v111_v28, %v110_v27  ;;  %v169_v58 = vld [vmem:[#allocation3 + $0x2f8] sm:$0xff]  ;;  %v321_v61 = vadd.f32 %v320_v49, %v260_v36 }
  0x58   :  { %v118_v33 = vld [vmem:[#allocation3 + $0x160] sm:$0xff]  ;;  %v119_v38 = vld [vmem:[#allocation3 + $0x168] sm:$0xff]  ;;  %v289_v44 = vadd.f32 %v288_v35, %v212_v29  ;;  %v264_v48 = vadd.f32 %v199_v32, %v198_v31  ;;  %v176_v62 = vld [vmem:[#allocation3 + $0x330] sm:$0xff]  ;;  %v249_v4 = vadd.f32 %v169_v58, %v168_v57  ;;  %v324_v14 = vadd.f32 %v323_v5, %v245_v60 }
  0x59   :  { %v126_v39 = vld [vmem:[#allocation3 + $0x1a0] sm:$0xff]  ;;  %v127_v40 = vld [vmem:[#allocation3 + $0x1a8] sm:$0xff]  ;;  %359 = vadd.xlane.f32.xlu0 %v287_v41  ;;  %v224_v55 = vadd.f32 %v119_v38, %v118_v33  ;;  %v177_v63 = vld [vmem:[#allocation3 + $0x338] sm:$0xff]  ;;  %v834_v58 = vmov 0.0|0.0  }
  0x5a   :  { %v134_v42 = vld [vmem:[#allocation3 + $0x1e0] sm:$0xff]  ;;  %v135_v54 = vld [vmem:[#allocation3 + $0x1e8] sm:$0xff]  ;;  %v290_v56 = vadd.f32 %v289_v44, %v216_v34  ;;  %v228_v0 = vadd.f32 %v127_v40, %v126_v39  ;;  %v184_v2 = vld [vmem:[#allocation3 + $0x370] sm:$0xff]  ;;  %v322_v6 = vadd.f32 %v321_v61, %v264_v48  ;;  %v253_v13 = vadd.f32 %v177_v63, %v176_v62  ;;  %704 = vmatprep.subr.bf16.mxu0 %v834_v58 }
  0x5b   :  { %v185_v3 = vld [vmem:[#allocation3 + $0x378] sm:$0xff]  ;;  %v232_v7 = vadd.f32 %v135_v54, %v134_v42  ;;  %v192_v8 = vld [vmem:[#allocation3 + $0x3b0] sm:$0xff]  ;;  %v325_v25 = vadd.f32 %v324_v14, %v249_v4  ;;  %v383_v57 = vld [vmem:[#allocation6 + $0x8] sm:$0xff]  ;;  %710 = vmatprep.subr.bf16.mxu1 %v834_v58  ;;  %v836_v63 = vmov 0.0  }
  0x5c   :  { %v291_v1 = vadd.f32 %v290_v56, %v220_v43  ;;  %v193_v9 = vld [vmem:[#allocation3 + $0x3b8] sm:$0xff]  ;;  %v80_v10 = vld [vmem:[#allocation3 + $0x30] sm:$0xff]  ;;  %369 = vadd.xlane.f32.xlu1 %v322_v6  ;;  %v257_v24 = vadd.f32 %v185_v3, %v184_v2  ;;  %v382_v56 = vld [vmem:[#allocation6] sm:$0xff]  ;;  %690 = vmatprep.mubr.msk.f32.mxu0 %vm835_vm0, %v836_v63  ;;  %v386_v2 = vlaneseq }
  0x5d   :  { %v81_v11 = vld [vmem:[#allocation3 + $0x38] sm:$0xff]  ;;  %v88_v15 = vld [vmem:[#allocation3 + $0x70] sm:$0xff]  ;;  %v261_v34 = vadd.f32 %v193_v9, %v192_v8  ;;  %v326_v35 = vadd.f32 %v325_v25, %v253_v13  ;;  %v705_v59 = vpack.c.bf16 %v383_v57, %v382_v56  ;;  %701 = vmatprep.mubr.msk.f32.mxu1 %vm835_vm0, %v836_v63 }
  0x5e   :  { %v292_v12 = vadd.f32 %v291_v1, %v224_v55  ;;  %v89_v16 = vld [vmem:[#allocation3 + $0x78] sm:$0xff]  ;;  %v96_v17 = vld [vmem:[#allocation3 + $0xb0] sm:$0xff]  ;;  %v205_v18 = vadd.f32 %v81_v11, %v80_v10  ;;  %v399_v4 = vand.u32 127, %v386_v2  ;;  %v913_v9 = vshrl.u32 %v386_v2, 7 }
  0x5f   :  { %v97_v19 = vld [vmem:[#allocation3 + $0xb8] sm:$0xff]  ;;  %v104_v20 = vld [vmem:[#allocation3 + $0xf0] sm:$0xff]  ;;  %v209_v22 = vadd.f32 %v89_v16, %v88_v15  ;;  %v327_v41 = vadd.f32 %v326_v35, %v257_v24  ;;  %706 = vmatpush3.bf16.msra.mxu0 %v705_v59 }
  0x60   :  { %v105_v21 = vld [vmem:[#allocation3 + $0xf8] sm:$0xff]  ;;  %v293_v23 = vadd.f32 %v292_v12, %v228_v0  ;;  %v112_v26 = vld [vmem:[#allocation3 + $0x130] sm:$0xff]  ;;  %v213_v28 = vadd.f32 %v97_v19, %v96_v17  ;;  %707 = vmatprep.subr.bf16.mxu0 %v834_v58  ;;  %v404_v6 = vadd.s32 4294967288, %v399_v4  ;;  %v411_v8 = vadd.s32 4294967280, %v399_v4 }
  0x61   :  { %v113_v27 = vld [vmem:[#allocation3 + $0x138] sm:$0xff]  ;;  %v200_v29 = vld [vmem:[#allocation3 + $0x3f0] sm:$0xff]  ;;  %v217_v31 = vadd.f32 %v105_v21, %v104_v20  ;;  %v295_v32 = vadd.f32 %v209_v22, %v205_v18  ;;  %v328_v46 = vadd.f32 %v327_v41, %v261_v34  ;;  %v418_v10 = vadd.s32 4294967272, %v399_v4  ;;  %v553_v41 = vld [vmem:[#allocation8] sm:$0xff] }
  0x62   :  { %v201_v30 = vld [vmem:[#allocation3 + $0x3f8] sm:$0xff]  ;;  %v294_v33 = vadd.f32 %v293_v23, %v232_v7  ;;  %v120_v36 = vld [vmem:[#allocation3 + $0x170] sm:$0xff]  ;;  %v221_v38 = vadd.f32 %v113_v27, %v112_v26  ;;  %v407_v11 = vsub.s32 %v404_v6, %v913_v9  ;;  %v414_v14 = vsub.s32 %v411_v8, %v913_v9 }
  0x63   :  { %v121_v37 = vld [vmem:[#allocation3 + $0x178] sm:$0xff]  ;;  %v296_v39 = vadd.f32 %v295_v32, %v213_v28  ;;  %v265_v40 = vadd.f32 %v201_v30, %v200_v29  ;;  %v128_v42 = vld [vmem:[#allocation3 + $0x1b0] sm:$0xff]  ;;  %v402_v16 = vsub.s32 %v399_v4, %v913_v9  ;;  %v421_v19 = vsub.s32 %v418_v10, %v913_v9 }
  0x64   :  { %361 = vadd.xlane.f32.xlu0 %v294_v33  ;;  %v129_v43 = vld [vmem:[#allocation3 + $0x1b8] sm:$0xff]  ;;  %v225_v44 = vadd.f32 %v121_v37, %v120_v36  ;;  %v136_v47 = vld [vmem:[#allocation3 + $0x1f0] sm:$0xff]  ;;  %v545_v10 = vsub.s32 1, %v913_v9 }
  0x65   :  { %v297_v45 = vadd.f32 %v296_v39, %v217_v31  ;;  %v137_v48 = vld [vmem:[#allocation3 + $0x1f8] sm:$0xff]  ;;  %v229_v49 = vadd.f32 %v129_v43, %v128_v42  ;;  %v329_v51 = vadd.f32 %v328_v46, %v265_v40  ;;  %v384_v60 = vld [vmem:[#allocation6 + $0x10] sm:$0xff]  ;;  %v554_v42 = vld [vmem:[#allocation8 + $0x8] sm:$0xff] }
  0x66   :  { %v233_v52 = vadd.f32 %v137_v48, %v136_v47  ;;  %v385_v61 = vld [vmem:[#allocation6 + $0x18] sm:$0xff]  ;;  %v711_v43 = vpack.c.bf16 %v554_v42, %v553_v41  ;;  %v388_v47 = vsub.s32 0, %v913_v9  ;;  %v381_v48 = vld [vmem:[%s948_s2] sm:$0x7] }
  0x67   :  { %v298_v50 = vadd.f32 %v297_v45, %v221_v38  ;;  %371 = vadd.xlane.f32.xlu1 %v329_v51  ;;  %v708_v62 = vpack.c.bf16 %v385_v61, %v384_v60  ;;  %v556_v45 = vld [vmem:[#allocation8 + $0x18] sm:$0xff] }
  0x68   :  { %712 = vmatpush3.bf16.msra.mxu1 %v711_v43 }
  0x69   :  { %v299_v53 = vadd.f32 %v298_v50, %v225_v44  ;;  %709 = vmatpush3.bf16.msra.mxu0 %v708_v62  ;;  %713 = vmatprep.subr.bf16.mxu1 %v834_v58  ;;  %v555_v44 = vld [vmem:[#allocation8 + $0x10] sm:$0xff] }
  0x6a   :  { %v714_v46 = vpack.c.bf16 %v556_v45, %v555_v44 }
  0x6b   :  { %v300_v54 = vadd.f32 %v299_v53, %v229_v49  ;;  %v389_v49 = vrot.slane %v381_v48, %v388_v47 }
  0x6c   :  { %715 = vmatpush3.bf16.msra.mxu1 %v714_v46 }
  0x6d   :  { %v301_v55 = vadd.f32 %v300_v54, %v233_v52 }
  0x6f   :  { %363 = vadd.xlane.f32.xlu0 %v301_v55 }
  0xd6   :  { %v366_v0 = vpop.xlane.xlu1 %365 }
  0xd7   :  { %v377_v17 = vmul.f32 0.00048828125, %v366_v0 }
  0xd9   :  { %v428_v26 = vrot.slane %v377_v17, %v402_v16 }
  0xdd   :  { %v358_v1 = vpop.xlane.xlu0 %357  ;;  %v368_v3 = vpop.xlane.xlu1 %367 }
  0xde   :  { %v378_v12 = vmul.f32 0.00048828125, %v368_v3  ;;  %v373_v23 = vmul.f32 0.00048828125, %v358_v1 }
  0xe0   :  { %v432_v24 = vrot.slane %v378_v12, %v407_v11  ;;  %v403_v31 = vrot.slane %v373_v23, %v402_v16  ;;  %v546_v12 = vrot.slane %v381_v48, %v545_v10 }
  0xe2   :  { %v433_v32 = vsel %vm409_vm1, %v432_v24, %v428_v26 }
  0xe6   :  { %v360_v5 = vpop.xlane.xlu0 %359 }
  0xe7   :  { %v374_v18 = vmul.f32 0.00048828125, %v360_v5 }
  0xe9   :  { %v370_v7 = vpop.xlane.xlu1 %369  ;;  %v408_v27 = vrot.slane %v374_v18, %v407_v11  ;;  %v550_v11 = vsub.s32 2, %v913_v9  ;;  %v670_v18 = vld [vmem:[%s950_s4] ss:$0 sm:$0xff]  ;;  %s837_s4 = smov [#allocation9]  }
  0xea   :  { %v379_v15 = vmul.f32 0.00048828125, %v370_v7  ;;  %s659_s8 = sshll.u32 %s837_s4, 4  ;;  %s660_s8 = int_to_ptr.vmem [resolvable:$true] %s659_s8 }
  0xeb   :  { %v410_v35 = vsel %vm409_vm1, %v408_v27, %v403_v31  ;;  %s799_s9 = scalar_lea.vmem %s660_s8, 32  ;;  %p804_p11 = scmp.lt.s32.totalorder %s660_s8, %s660_s8 }
  0xec   :  { %v437_v25 = vrot.slane %v379_v15, %v414_v14  ;;  %v551_v15 = vrot.slane %v381_v48, %v550_v11  ;;  %p800_p10 = scmp.ne.s32.totalorder %s660_s8, %s799_s9  ;;  %p805_p12 = scmp.lt.s32.totalorder %s799_s9, %s799_s9 }
  0xee   :  { %v438_v34 = vsel %vm416_vm2, %v437_v25, %v433_v32  ;;  %p806_p13 = por %p805_p12, %p804_p11 }
  0xf0   :  { %p807_p0 = pnand %p806_p13, %p800_p10 }
  0xf1   :  { %v362_v13 = vpop.xlane.xlu0 %361 }
  0xf2   :  { %v375_v21 = vmul.f32 0.00048828125, %v362_v13 }
  0xf4   :  { %v372_v20 = vpop.xlane.xlu1 %371  ;;  %v415_v29 = vrot.slane %v375_v21, %v414_v14 }
  0xf5   :  { %v380_v22 = vmul.f32 0.00048828125, %v372_v20 }
  0xf6   :  { %v417_v38 = vsel %vm416_vm2, %v415_v29, %v410_v35 }
  0xf7   :  { %v442_v28 = vrot.slane %v380_v22, %v421_v19 }
  0xf9   :  { %v443_v37 = vsel %vm423_vm3, %v442_v28, %v438_v34 }
  0xfc   :  { %v364_v30 = vpop.xlane.xlu0 %363 }
  0xfd   :  { %v376_v33 = vmul.f32 0.00048828125, %v364_v30 }
  0xff   :  { %v422_v36 = vrot.slane %v376_v33, %v421_v19 }
 0x101   :  { %v424_v39 = vsel %vm423_vm3, %v422_v36, %v417_v38 }
 0x102   :  { %v445_v40 = vsel %vm444_vm4, %v443_v37, %v424_v39 }
 0x103   :  { %691 = vmatmul.mubr.msk.f32.vlgmr.msra.gmra.mrb[0].mxu0 %vm446_vm5, %v445_v40 }
 0x1d6   :  { %v515_v50 = vpop.f32.mrb[0].mxu0 }
 0x1d7   :  { %v516_v51 = vadd.f32 %v515_v50, %v389_v49  ;;  %v692_v52 = vpop.f32.mrb[1].mxu0 }
 0x1d9   :  { %v519_v53 = vmax.f32 %v516_v51, 0.0 }
 0x1db   :  { %v521_v54 = vsel %vm520_vm6, %v519_v53, 0.0 }
 0x1dc   :  { %v522_v55 = vrot.slane %v521_v54, 4 }
 0x1de   :  { %v523_v56 = vadd.f32 %v522_v55, %v521_v54 }
 0x1e0   :  { %v524_v57 = vrot.slane %v523_v56, 2 }
 0x1e2   :  { %v525_v58 = vadd.f32 %v524_v57, %v523_v56 }
 0x1e4   :  { %v526_v59 = vrot.slane %v525_v58, 1 }
 0x1e6   :  { %v527_v60 = vadd.f32 %v526_v59, %v525_v58 }
 0x1e8   :  { %v529_v61 = vmul.f32 0.5, %v527_v60 }
 0x1ea   :  { %v530_v62 = vsub.f32 %v519_v53, %v529_v61 }
 0x1ec   :  { %v531_v63 = vmul.f32 %v530_v62, %v530_v62 }
 0x1ee   :  { %v532_v0 = vsel %vm520_vm6, %v531_v63, 0.0 }
 0x1ef   :  { %v533_v1 = vrot.slane %v532_v0, 4 }
 0x1f1   :  { %v534_v2 = vadd.f32 %v533_v1, %v532_v0 }
 0x1f3   :  { %v535_v3 = vrot.slane %v534_v2, 2 }
 0x1f5   :  { %v536_v4 = vadd.f32 %v535_v3, %v534_v2 }
 0x1f7   :  { %v537_v5 = vrot.slane %v536_v4, 1 }
 0x1f9   :  { %v538_v6 = vadd.f32 %v537_v5, %v536_v4 }
 0x1fb   :  { %v539_v7 = vmul.f32 0.5, %v538_v6 }
 0x1fd   :  { %v540_v8 = vadd.f32 1e-05, %v539_v7 }
 0x1ff   :  { %727 = vrsqrt.f32 %v540_v8 }
 0x209   :  { %v728_v13 = vpop.eup %727 }
 0x20a   :  { %v542_v14 = vmul.f32 %v728_v13, %v530_v62 }
 0x20c   :  { %v547_v16 = vmul.f32 %v546_v12, %v542_v14 }
 0x20e   :  { %v552_v17 = vadd.f32 %v551_v15, %v547_v16 }
 0x210   :  { %702 = vmatmul.mubr.msk.f32.vlgmr.msra.gmra.mrb[0].mxu1 %vm446_vm5, %v552_v17 }
 0x2e3   :  { %v633_v19 = vpop.f32.mrb[0].mxu1 }
 0x2e4   :  { %v634_v20 = vadd.f32 %v670_v18, %v633_v19  ;;  %v703_v21 = vpop.f32.mrb[1].mxu1 }
 0x2e6   :  { %v638_v22 = vsel %vm637_vm7, %v634_v20, -inf }
 0x2e7   :  { %639 = vmax.xlane.f32.xlu0 %v638_v22 }
 0x374   :  { %v640_v9 = vpop.xlane.xlu0 %639 }
 0x375   :  { %v641_v23 = vsub.f32 %v634_v20, %v640_v9 }
 0x377   :  { %v642_v24 = vmul.f32 1.442695, %v641_v23 }
 0x379   :  { %729 = vpow2.f32 %v642_v24 }
 0x383   :  { %v730_v25 = vpop.eup %729 }
 0x384   :  { %v644_v26 = vsel %vm637_vm7, %v730_v25, 0.0 }
 0x385   :  { %645 = vadd.xlane.f32.xlu1 %v644_v26 }
 0x412   :  { %v646_v27 = vpop.xlane.xlu1 %645 }
 0x413   :  { %731 = vrcp.f32 %v646_v27 }
 0x41d   :  { %v732_v28 = vpop.eup %731 }
 0x41e   :  { %v648_v29 = vmul.f32 %v732_v28, %v646_v27 }
 0x420   :  { %v649_v30 = vsub.f32 2.0, %v648_v29 }
 0x422   :  { %v650_v31 = vmul.f32 %v732_v28, %v649_v30 }
 0x424   :  { %v651_v32 = vmul.f32 %v730_v25, %v650_v31 }
 0x426   :  { %652 = vst.msk [vmem:[#allocation9] sm:$0x3] %vm637_vm7, %v651_v32 }
 0x427   :  { %810 = shalt.err (!%p807_p0)
}
 0x428   :  { %s811_s12 = scalar_lea.hbm %s951_s5, 32 }
 0x429   :  { %p812_p1 = scmp.ne.s32.totalorder %s951_s5, %s811_s12  ;;  %p815_p2 = scmp.lt.u32.totalorder %s811_s12, %s951_s5 }
 0x42b   :  { %p817_p3 = pnand %p815_p2, %p812_p1 }
 0x42d   :  { %820 = shalt.err (!%p817_p3)
}
 0x42e   :  { %662 = dma.vmem_to_hbm [thread:$0]  %s660_s8, 32, %s951_s5, [#allocation5]  }
 0x42f   :  { %825 = dma.done.wait [#allocation5], 32  }
 0x430   :  { %826 = vsyncadd [#allocation5], 4294967264 }
 0x431   :  { %666 = vsyncpa [#allocation4], 1 }
 0x432   :  { %667 = vsyncpa [#allocation7], 1 }
 0x433   :  { %668 = vsyncpa [#allocation5], 1 }

</bundles_post_ra>
